<compile_context>
chip_gen: v7x
topology: tpu7x:2x2x1
jax: 0.10.0
libtpu: 0.0.40
codegen_flags: <defaults>
</compile_context>

<pallas_src>
import jax
import jax.numpy as jnp
from jax.experimental import pallas as pl
from jax.experimental.pallas import tpu as pltpu


def _decoder_kernel(z_ref,
                    w1_ref, b1_ref,
                    w2_ref, b2_ref,
                    w3_ref, b3_ref,
                    w4_ref, b4_ref,
                    out_ref):
    z = z_ref[...]

    # Linear(latent_dim, inter_dims[-1]) + ReLU
    h = jnp.dot(z, w1_ref[...], preferred_element_type=jnp.float32) + b1_ref[...]
    h = jnp.maximum(h, 0.0)

    # Linear(inter_dims[-1], inter_dims[-2]) + ReLU
    h = jnp.dot(h, w2_ref[...], preferred_element_type=jnp.float32) + b2_ref[...]
    h = jnp.maximum(h, 0.0)

    # Linear(inter_dims[-2], inter_dims[-3]) + ReLU
    h = jnp.dot(h, w3_ref[...], preferred_element_type=jnp.float32) + b3_ref[...]
    h = jnp.maximum(h, 0.0)

    # Final Linear(inter_dims[-3], input_dim) — no activation
    y = jnp.dot(h, w4_ref[...], preferred_element_type=jnp.float32) + b4_ref[...]

    out_ref[...] = y.astype(out_ref.dtype)


def _pick_batch_tile(B, cap=512):
    """Largest multiple-of-8 divisor of B that is <= cap; prefer >=2 grid steps."""
    if B % 8 != 0:
        # Tiny / ragged batch: single full-array block (full dims are exempt
        # from the (8,128) divisibility rule).
        return B
    best = B
    for t in range(min(cap, B), 7, -8):
        if B % t == 0:
            best = t
            break
    if best == B and B > 8:
        half = B // 2
        if B % 2 == 0 and half % 8 == 0:
            best = half  # force >=2 grid steps -> pipelining / v7x megacore
    return best


def decoder_forward(z, params, *, batch_tile=None):
    """Run the Decoder forward pass as a single Pallas TPU kernel.

    Args:
      z: (B, latent_dim) float32.
      params: dict with keys w1,b1,w2,b2,w3,b3,w4,b4; weights are (in, out),
              biases are (1, out) — i.e. transposed vs. PyTorch Linear.
    Returns:
      x_rec_mean: (B, input_dim) float32.
    """
    B, latent_dim = z.shape
    input_dim = params["w4"].shape[1]

    if batch_tile is None:
        batch_tile = _pick_batch_tile(B)
    assert B % batch_tile == 0, "batch must be divisible by batch_tile (pad the batch)"
    assert batch_tile % 8 == 0 or batch_tile == B, \
        "batch_tile must be a multiple of 8 (or the full batch)"

    grid = (B // batch_tile,)

    def row_map(i):      # z / output: tile along the batch dimension
        return (i, 0)

    def rep_map(i):      # weights / biases: same block every grid step
        return (0, 0)

    in_specs = [pl.BlockSpec((batch_tile, latent_dim), row_map)]
    args = [z]
    for name in ("w1", "b1", "w2", "b2", "w3", "b3", "w4", "b4"):
        p = params[name]
        in_specs.append(pl.BlockSpec(p.shape, rep_map))
        args.append(p)

    out = pl.pallas_call(
        _decoder_kernel,
        out_shape=jax.ShapeDtypeStruct((B, input_dim), jnp.float32),
        grid=grid,
        in_specs=in_specs,
        out_specs=pl.BlockSpec((batch_tile, input_dim), row_map),
        compiler_params=pltpu.CompilerParams(
            dimension_semantics=("parallel",),
            vmem_limit_bytes=64 * 1024 * 1024,
        ),
    )(*args)
    return out


def init_decoder_params(key, input_dim, inter_dims, latent_dim):
    """Deterministic init mimicking PyTorch Linear default (uniform ±1/sqrt(fan_in)).

    Weights are stored as (in_features, out_features) for x @ W.
    Layer order matches the PyTorch Decoder: latent -> inter[-1] -> inter[-2]
    -> inter[-3] -> input_dim.
    """
    dims = [
        ("w1", "b1", latent_dim, inter_dims[-1]),
        ("w2", "b2", inter_dims[-1], inter_dims[-2]),
        ("w3", "b3", inter_dims[-2], inter_dims[-3]),
        ("w4", "b4", inter_dims[-3], input_dim),
    ]
    params = {}
    for wname, bname, fan_in, fan_out in dims:
        key, kw, kb = jax.random.split(key, 3)
        bound = 1.0 / jnp.sqrt(fan_in)
        params[wname] = jax.random.uniform(
            kw, (fan_in, fan_out), jnp.float32, -bound, bound)
        params[bname] = jax.random.uniform(
            kb, (1, fan_out), jnp.float32, -bound, bound)
    return params


def decoder_reference(z, params):
    """Pure-JAX reference of the same forward pass."""
    h = jnp.maximum(z @ params["w1"] + params["b1"], 0.0)
    h = jnp.maximum(h @ params["w2"] + params["b2"], 0.0)
    h = jnp.maximum(h @ params["w3"] + params["b3"], 0.0)
    return h @ params["w4"] + params["b4"]


if __name__ == "__main__":
    # Small shapes consistent with the module's forward: z is (batch, latent_dim).
    batch = 64            # default tiling picks batch_tile=32 -> grid=(2,)
    input_dim = 32
    inter_dims = (64, 64, 32)
    latent_dim = 4

    key = jax.random.PRNGKey(0)
    key, kz = jax.random.split(key)
    z = jax.random.normal(kz, (batch, latent_dim), jnp.float32)

    params = init_decoder_params(key, input_dim, inter_dims, latent_dim)

    x_rec = decoder_forward(z, params)
    jax.block_until_ready(x_rec)

    x_ref = decoder_reference(z, params)
    assert x_rec.shape == (batch, input_dim)
    assert jnp.allclose(x_rec, x_ref, atol=1e-5, rtol=1e-5)

    # Also exercise an explicit multi-step grid (pipelined batch tiles).
    x_rec_tiled = decoder_forward(z, params, batch_tile=16)   # grid=(4,)
    jax.block_until_ready(x_rec_tiled)
    assert jnp.allclose(x_rec_tiled, x_ref, atol=1e-5, rtol=1e-5)

    print("KERNEL_OK")
</pallas_src>

<mosaic_0001>
module attributes {stable_mosaic.version = 11 : i64} {
  func.func @_decoder_kernel(%arg0: i32, %arg1: memref<32x4xf32, #tpu.memory_space<vmem>>, %arg2: memref<4x32xf32, #tpu.memory_space<vmem>>, %arg3: memref<1x32xf32, #tpu.memory_space<vmem>>, %arg4: memref<32x64xf32, #tpu.memory_space<vmem>>, %arg5: memref<1x64xf32, #tpu.memory_space<vmem>>, %arg6: memref<64x64xf32, #tpu.memory_space<vmem>>, %arg7: memref<1x64xf32, #tpu.memory_space<vmem>>, %arg8: memref<64x32xf32, #tpu.memory_space<vmem>>, %arg9: memref<1x32xf32, #tpu.memory_space<vmem>>, %arg10: memref<32x32xf32, #tpu.memory_space<vmem>>) attributes {dimension_semantics = [#tpu.dimension_semantics<parallel>], iteration_bounds = array<i64: 2>, scalar_prefetch = 0 : i64, scratch_operands = 0 : i64, tpu.core_type = #tpu.core_type<tc>, window_params = [{transform_indices = @transform_0, window_bounds = array<i64: 32, 4>}, {pipeline_mode = #tpu.pipeline_mode<synchronous>, transform_indices = @transform_1, window_bounds = array<i64: 4, 32>}, {pipeline_mode = #tpu.pipeline_mode<synchronous>, transform_indices = @transform_2, window_bounds = array<i64: 1, 32>}, {pipeline_mode = #tpu.pipeline_mode<synchronous>, transform_indices = @transform_3, window_bounds = array<i64: 32, 64>}, {pipeline_mode = #tpu.pipeline_mode<synchronous>, transform_indices = @transform_4, window_bounds = array<i64: 1, 64>}, {pipeline_mode = #tpu.pipeline_mode<synchronous>, transform_indices = @transform_5, window_bounds = array<i64: 64, 64>}, {pipeline_mode = #tpu.pipeline_mode<synchronous>, transform_indices = @transform_6, window_bounds = array<i64: 1, 64>}, {pipeline_mode = #tpu.pipeline_mode<synchronous>, transform_indices = @transform_7, window_bounds = array<i64: 64, 32>}, {pipeline_mode = #tpu.pipeline_mode<synchronous>, transform_indices = @transform_8, window_bounds = array<i64: 1, 32>}, {transform_indices = @transform_9, window_bounds = array<i64: 32, 32>}]} {
    %c0 = arith.constant 0 : index
    %c0_0 = arith.constant 0 : index
    %0 = vector.load %arg1[%c0, %c0_0] : memref<32x4xf32, #tpu.memory_space<vmem>>, vector<32x4xf32>
    %c0_1 = arith.constant 0 : index
    %c0_2 = arith.constant 0 : index
    %1 = vector.load %arg2[%c0_1, %c0_2] : memref<4x32xf32, #tpu.memory_space<vmem>>, vector<4x32xf32>
    %cst = arith.constant dense<0.000000e+00> : vector<32x32xf32>
    %2 = tpu.matmul %0, %1, %cst {dimension_numbers = #tpu.dot_dimension_numbers<[1], [0], [0], [1], [0, 0, 1, 1], [], []>} : vector<32x4xf32>, vector<4x32xf32>, vector<32x32xf32> -> vector<32x32xf32>
    %c0_3 = arith.constant 0 : index
    %c0_4 = arith.constant 0 : index
    %3 = vector.load %arg3[%c0_3, %c0_4] : memref<1x32xf32, #tpu.memory_space<vmem>>, vector<1x32xf32>
    %4 = vector.broadcast %3 : vector<1x32xf32> to vector<32x32xf32>
    %5 = arith.addf %2, %4 : vector<32x32xf32>
    %cst_5 = arith.constant 0.000000e+00 : f32
    %6 = vector.broadcast %cst_5 : f32 to vector<32x32xf32>
    %7 = arith.maximumf %5, %6 : vector<32x32xf32>
    %c0_6 = arith.constant 0 : index
    %c0_7 = arith.constant 0 : index
    %8 = vector.load %arg4[%c0_6, %c0_7] : memref<32x64xf32, #tpu.memory_space<vmem>>, vector<32x64xf32>
    %cst_8 = arith.constant dense<0.000000e+00> : vector<32x64xf32>
    %9 = tpu.matmul %7, %8, %cst_8 {dimension_numbers = #tpu.dot_dimension_numbers<[1], [0], [0], [1], [0, 0, 1, 1], [], []>} : vector<32x32xf32>, vector<32x64xf32>, vector<32x64xf32> -> vector<32x64xf32>
    %c0_9 = arith.constant 0 : index
    %c0_10 = arith.constant 0 : index
    %10 = vector.load %arg5[%c0_9, %c0_10] : memref<1x64xf32, #tpu.memory_space<vmem>>, vector<1x64xf32>
    %11 = vector.broadcast %10 : vector<1x64xf32> to vector<32x64xf32>
    %12 = arith.addf %9, %11 : vector<32x64xf32>
    %cst_11 = arith.constant 0.000000e+00 : f32
    %13 = vector.broadcast %cst_11 : f32 to vector<32x64xf32>
    %14 = arith.maximumf %12, %13 : vector<32x64xf32>
    %c0_12 = arith.constant 0 : index
    %c0_13 = arith.constant 0 : index
    %15 = vector.load %arg6[%c0_12, %c0_13] : memref<64x64xf32, #tpu.memory_space<vmem>>, vector<64x64xf32>
    %cst_14 = arith.constant dense<0.000000e+00> : vector<32x64xf32>
    %16 = tpu.matmul %14, %15, %cst_14 {dimension_numbers = #tpu.dot_dimension_numbers<[1], [0], [0], [1], [0, 0, 1, 1], [], []>} : vector<32x64xf32>, vector<64x64xf32>, vector<32x64xf32> -> vector<32x64xf32>
    %c0_15 = arith.constant 0 : index
    %c0_16 = arith.constant 0 : index
    %17 = vector.load %arg7[%c0_15, %c0_16] : memref<1x64xf32, #tpu.memory_space<vmem>>, vector<1x64xf32>
    %18 = vector.broadcast %17 : vector<1x64xf32> to vector<32x64xf32>
    %19 = arith.addf %16, %18 : vector<32x64xf32>
    %cst_17 = arith.constant 0.000000e+00 : f32
    %20 = vector.broadcast %cst_17 : f32 to vector<32x64xf32>
    %21 = arith.maximumf %19, %20 : vector<32x64xf32>
    %c0_18 = arith.constant 0 : index
    %c0_19 = arith.constant 0 : index
    %22 = vector.load %arg8[%c0_18, %c0_19] : memref<64x32xf32, #tpu.memory_space<vmem>>, vector<64x32xf32>
    %cst_20 = arith.constant dense<0.000000e+00> : vector<32x32xf32>
    %23 = tpu.matmul %21, %22, %cst_20 {dimension_numbers = #tpu.dot_dimension_numbers<[1], [0], [0], [1], [0, 0, 1, 1], [], []>} : vector<32x64xf32>, vector<64x32xf32>, vector<32x32xf32> -> vector<32x32xf32>
    %c0_21 = arith.constant 0 : index
    %c0_22 = arith.constant 0 : index
    %24 = vector.load %arg9[%c0_21, %c0_22] : memref<1x32xf32, #tpu.memory_space<vmem>>, vector<1x32xf32>
    %25 = vector.broadcast %24 : vector<1x32xf32> to vector<32x32xf32>
    %26 = arith.addf %23, %25 : vector<32x32xf32>
    %c0_23 = arith.constant 0 : index
    %c0_24 = arith.constant 0 : index
    %27 = vector.load %arg10[%c0_23, %c0_24] : memref<32x32xf32, #tpu.memory_space<vmem>>, vector<32x32xf32>
    tpu.vector_store %arg10[%c0_23, %c0_24], %26 {strides = array<i32>} : memref<32x32xf32, #tpu.memory_space<vmem>>, vector<32x32xf32>,
    return
  }
  func.func @transform_0(%arg0: i32) -> (i32, i32) {
    %c0_i32 = arith.constant 0 : i32
    %c0_i32_0 = arith.constant 0 : i32
    return %arg0, %c0_i32 : i32, i32
  }
  func.func @transform_1(%arg0: i32) -> (i32, i32) {
    %c0_i32 = arith.constant 0 : i32
    %c0_i32_0 = arith.constant 0 : i32
    %c0_i32_1 = arith.constant 0 : i32
    return %c0_i32, %c0_i32_0 : i32, i32
  }
  func.func @transform_2(%arg0: i32) -> (i32, i32) {
    %c0_i32 = arith.constant 0 : i32
    %c0_i32_0 = arith.constant 0 : i32
    %c0_i32_1 = arith.constant 0 : i32
    return %c0_i32, %c0_i32_0 : i32, i32
  }
  func.func @transform_3(%arg0: i32) -> (i32, i32) {
    %c0_i32 = arith.constant 0 : i32
    %c0_i32_0 = arith.constant 0 : i32
    %c0_i32_1 = arith.constant 0 : i32
    return %c0_i32, %c0_i32_0 : i32, i32
  }
  func.func @transform_4(%arg0: i32) -> (i32, i32) {
    %c0_i32 = arith.constant 0 : i32
    %c0_i32_0 = arith.constant 0 : i32
    %c0_i32_1 = arith.constant 0 : i32
    return %c0_i32, %c0_i32_0 : i32, i32
  }
  func.func @transform_5(%arg0: i32) -> (i32, i32) {
    %c0_i32 = arith.constant 0 : i32
    %c0_i32_0 = arith.constant 0 : i32
    %c0_i32_1 = arith.constant 0 : i32
    return %c0_i32, %c0_i32_0 : i32, i32
  }
  func.func @transform_6(%arg0: i32) -> (i32, i32) {
    %c0_i32 = arith.constant 0 : i32
    %c0_i32_0 = arith.constant 0 : i32
    %c0_i32_1 = arith.constant 0 : i32
    return %c0_i32, %c0_i32_0 : i32, i32
  }
  func.func @transform_7(%arg0: i32) -> (i32, i32) {
    %c0_i32 = arith.constant 0 : i32
    %c0_i32_0 = arith.constant 0 : i32
    %c0_i32_1 = arith.constant 0 : i32
    return %c0_i32, %c0_i32_0 : i32, i32
  }
  func.func @transform_8(%arg0: i32) -> (i32, i32) {
    %c0_i32 = arith.constant 0 : i32
    %c0_i32_0 = arith.constant 0 : i32
    %c0_i32_1 = arith.constant 0 : i32
    return %c0_i32, %c0_i32_0 : i32, i32
  }
  func.func @transform_9(%arg0: i32) -> (i32, i32) {
    %c0_i32 = arith.constant 0 : i32
    %c0_i32_0 = arith.constant 0 : i32
    return %arg0, %c0_i32 : i32, i32
  }
}

</mosaic_0001>

<bundles_post_ra>
// kernel: tpu_custom_call.1
= control target key start
LH: loop header
LB: loop body
LE: loop exit
PB: predicated region body
PF: predicated region fallthrough
CT: control target
= control target key end

     0   :  { %s2209_s0 = inlined_call_operand.hbm [shape: f32[64,4], index: 0, kind: input, shape index: {}]   ;;  %s2210_s1 = inlined_call_operand.hbm [shape: f32[4,32], index: 1, kind: input, shape index: {}]   ;;  %s2211_s2 = inlined_call_operand.hbm [shape: f32[1,32], index: 2, kind: input, shape index: {}]   ;;  %s2212_s3 = inlined_call_operand.hbm [shape: f32[32,64], index: 3, kind: input, shape index: {}]   ;;  %s2213_s4 = inlined_call_operand.hbm [shape: f32[1,64], index: 4, kind: input, shape index: {}]   ;;  %s2214_s5 = inlined_call_operand.hbm [shape: f32[64,64], index: 5, kind: input, shape index: {}]   ;;  %s2215_s6 = inlined_call_operand.hbm [shape: f32[1,64], index: 6, kind: input, shape index: {}]   ;;  %s2216_s7 = inlined_call_operand.hbm [shape: f32[64,32], index: 7, kind: input, shape index: {}]   ;;  %s2217_s8 = inlined_call_operand.hbm [shape: f32[1,32], index: 8, kind: input, shape index: {}]   ;;  %s2218_s9 = inlined_call_operand.hbm [shape: f32[64,32], index: 9, kind: output, shape index: {}]  }
   0x1   :  { %2223 = sst [smem:[#allocation24_spill]] %s2210_s1 }
   0x2   :  { %2224 = sst [smem:[#allocation25_spill]] %s2212_s3 }
   0x3   :  { %14 = vsyncpa [#allocation3], 0 }
   0x4   :  { %16 = vsyncpa [#allocation3 + $0x1], 0 }
   0x5   :  { %17 = vsyncpa [#allocation6], 0 }
   0x6   :  { %18 = vsyncpa [#allocation9], 0 }
   0x7   :  { %19 = vsyncpa [#allocation12], 0 }
   0x8   :  { %20 = vsyncpa [#allocation15], 0 }
   0x9   :  { %21 = vsyncpa [#allocation4], 0 }
   0xa   :  { %23 = vsyncpa [#allocation4 + $0x1], 0  ;;  %s1815_s30 = smov 0   ;;  %s1817_s10 = smov 0  }
   0xb   :  { %s1819_s11 = smov 0   ;;  %s1821_s12 = smov 0  }
   0xc LB: > { %s1751_s13 = smov [#allocation5]   ;;  %s1836_s15 = sadd.s32 4294967295, %s1749_s12   ;;  %s1749_s12 = sphi %s1821_s12, %s2252_s12   ;;  %s1745_s11 = sphi %s1819_s11, %s2251_s11   ;;  %s1741_s10 = sphi %s1817_s10, %s2250_s10   ;;  %s1737_s30 = sphi %s1815_s30, %s2249_s30  }
   0xd   : > { %s267_s14 = sshll.u32 %s1751_s13, 4  ;;  %p1087_p0 = scmp.ge.s32.totalorder %s1749_s12, 1  ;;  %s268_s14 = int_to_ptr.vmem [resolvable:$true] %s267_s14 }
   0xe   : > { %p2219_p1 = scmp.eq.s32.totalorder %s1836_s15, 0  ;;  %p254_p2 = scmp.lt.s32.totalorder %s1749_s12, 3 }
   0xf   : > { %s1752_s17 = smov [#allocation8]   ;;  %s1753_s20 = smov [#allocation11]  }
  0x10   : > { %p1841_p3 = pnand %p1087_p0, %p254_p2  ;;  %s288_s18 = sshll.u32 %s1752_s17, 4  ;;  %s1848_s18 = int_to_ptr.vmem [resolvable:$true] %s288_s18 }
  0x11   : > { %s312_s21 = sshll.u32 %s1753_s20, 4  ;;  %s2227_s1 = sld [smem:[#allocation24_spill]]  ;;  %s1856_s21 = int_to_ptr.vmem [resolvable:$true] %s312_s21 }
  0x12   : > { %s2225_s16 = scalar_select %p1841_p3, 1, 0 }
  0x13   : > { %p1318_p5 = pneg %p1841_p3 }
  0x15   : > { %p1852_p6 = pnand %p1318_p5, %p2219_p1 }
  0x17   : > { %s1413_s24 = scalar_lea.hbm %s2227_s1, 64  ;;  %p1866_p8 = pneg %p1852_p6 }
  0x18   : > { %p1414_p7 = scmp.ne.s32.totalorder %s2227_s1, %s1413_s24  ;;  %p1420_p11 = scmp.lt.u32.totalorder %s1413_s24, %s2227_s1 }
  0x1a   : > { %p1416_p9 = pnand %p1866_p8, %p1414_p7 }
  0x1c   : > { %p1417_p10 = pneg %p1416_p9 }
  0x1e   : > { %p1422_p12 = pnand %p1420_p11, %p1417_p10 }
  0x20   : > { %1425 = shalt.err (!%p1422_p12)
}
  0x21   : > { %s1426_s13 = scalar_lea.vmem %s268_s14, 64  ;;  %p1434_p5 = scmp.lt.s32.totalorder %s268_s14, %s268_s14 }
  0x22   : > { %p1427_p13 = scmp.ne.s32.totalorder %s268_s14, %s1426_s13  ;;  %p1435_p4 = scmp.lt.s32.totalorder %s1426_s13, %s1426_s13 }
  0x24   : > { %p1429_p0 = pnand %p1427_p13, %p1866_p8  ;;  %p1436_p1 = por %p1435_p4, %p1434_p5 }
  0x26   : > { %p1430_p2 = pneg %p1429_p0 }
  0x28   : > { %p1437_p3 = pnand %p1436_p1, %p1430_p2 }
  0x2a   : > { %1440 = shalt.err (!%p1437_p3)
}
  0x2b   : > { %1321 = dma.hbm_to_vmem [thread:$0]  (!%p1852_p6), %s2227_s1, 64, %s268_s14, [#allocation6]  }
  0x2c   : > { %s2229_s3 = sld [smem:[#allocation25_spill]] }
  0x32   : > { %s1441_s24 = scalar_lea.hbm %s2229_s3, 512 }
  0x33   : > { %p1442_p7 = scmp.ne.s32.totalorder %s2229_s3, %s1441_s24  ;;  %p1448_p1 = scmp.lt.u32.totalorder %s1441_s24, %s2229_s3 }
  0x35   : > { %p1444_p9 = pnand %p1442_p7, %p1866_p8 }
  0x37   : > { %p1445_p4 = pneg %p1444_p9 }
  0x39   : > { %p1450_p3 = pnand %p1448_p1, %p1445_p4 }
  0x3b   : > { %1453 = shalt.err (!%p1450_p3)
}
  0x3c   : > { %s1454_s14 = scalar_lea.vmem %s1848_s18, 512  ;;  %p1462_p13 = scmp.lt.s32.totalorder %s1848_s18, %s1848_s18 }
  0x3d   : > { %p1455_p10 = scmp.ne.s32.totalorder %s1848_s18, %s1454_s14  ;;  %p1463_p0 = scmp.lt.s32.totalorder %s1454_s14, %s1454_s14 }
  0x3f   : > { %p1457_p11 = pnand %p1455_p10, %p1866_p8  ;;  %p1464_p2 = por %p1463_p0, %p1462_p13 }
  0x41   : > { %p1458_p12 = pneg %p1457_p11 }
  0x43   : > { %p1465_p5 = pnand %p1464_p2, %p1458_p12 }
  0x45   : > { %1468 = shalt.err (!%p1465_p5)
}
  0x46   : > { %s2221_s13 = smov 128   ;;  %s1755_s17 = smov 8  }
  0x47   : > { %1327 = dma.hbm_to_vmem [thread:$0]  (!%p1852_p6), %s2229_s3, 512, %s1848_s18, [#allocation9], %s2221_s13, %s2221_s13, %s1755_s17  }
  0x48   : > { %s1469_s25 = scalar_lea.hbm %s2214_s5, 1024 }
  0x49   : > { %p1470_p7 = scmp.ne.s32.totalorder %s2214_s5, %s1469_s25  ;;  %p1476_p1 = scmp.lt.u32.totalorder %s1469_s25, %s2214_s5 }
  0x4b   : > { %p1472_p9 = pnand %p1470_p7, %p1866_p8 }
  0x4d   : > { %p1473_p4 = pneg %p1472_p9 }
  0x4f   : > { %p1478_p3 = pnand %p1476_p1, %p1473_p4 }
  0x51   : > { %1481 = shalt.err (!%p1478_p3)
}
  0x52   : > { %s1482_s18 = scalar_lea.vmem %s1856_s21, 1024  ;;  %p1490_p13 = scmp.lt.s32.totalorder %s1856_s21, %s1856_s21 }
  0x53   : > { %p1483_p10 = scmp.ne.s32.totalorder %s1856_s21, %s1482_s18  ;;  %p1491_p0 = scmp.lt.s32.totalorder %s1482_s18, %s1482_s18 }
  0x55   : > { %p1485_p11 = pnand %p1483_p10, %p1866_p8  ;;  %p1492_p2 = por %p1491_p0, %p1490_p13 }
  0x57   : > { %p1486_p12 = pneg %p1485_p11 }
  0x59   : > { %p1493_p5 = pnand %p1492_p2, %p1486_p12 }
  0x5b   : > { %1496 = shalt.err (!%p1493_p5)
}
  0x5c   : > { %1333 = dma.hbm_to_vmem [thread:$0]  (!%p1852_p6), %s2214_s5, 1024, %s1856_s21, [#allocation12], %s2221_s13, %s2221_s13, %s1755_s17  }
  0x5d   : > { %s1756_s23 = smov [#allocation14]   ;;  %s1757_s25 = smov [#allocation7]  }
  0x5e   : > { %s336_s24 = sshll.u32 %s1756_s23, 4  ;;  %s278_s26 = sshll.u32 %s1757_s25, 4  ;;  %s337_s24 = int_to_ptr.vmem [resolvable:$true] %s336_s24  ;;  %s279_s26 = int_to_ptr.vmem [resolvable:$true] %s278_s26 }
  0x5f   : > { %s1497_s14 = scalar_lea.hbm %s2216_s7, 1024 }
  0x60   : > { %p1498_p7 = scmp.ne.s32.totalorder %s2216_s7, %s1497_s14  ;;  %p1504_p1 = scmp.lt.u32.totalorder %s1497_s14, %s2216_s7 }
  0x62   : > { %p1500_p9 = pnand %p1498_p7, %p1866_p8 }
  0x64   : > { %p1501_p4 = pneg %p1500_p9 }
  0x66   : > { %p1506_p3 = pnand %p1504_p1, %p1501_p4 }
  0x68   : > { %1509 = shalt.err (!%p1506_p3)
}
  0x69   : > { %s1510_s21 = scalar_lea.vmem %s337_s24, 1024  ;;  %p1518_p13 = scmp.lt.s32.totalorder %s337_s24, %s337_s24 }
  0x6a   : > { %p1511_p10 = scmp.ne.s32.totalorder %s337_s24, %s1510_s21  ;;  %p1519_p0 = scmp.lt.s32.totalorder %s1510_s21, %s1510_s21 }
  0x6c   : > { %p1513_p11 = pnand %p1511_p10, %p1866_p8  ;;  %p1520_p2 = por %p1519_p0, %p1518_p13 }
  0x6e   : > { %p1514_p12 = pneg %p1513_p11 }
  0x70   : > { %p1521_p5 = pnand %p1520_p2, %p1514_p12 }
  0x72   : > { %1524 = shalt.err (!%p1521_p5)
}
  0x73   : > { %1339 = dma.hbm_to_vmem [thread:$0]  (!%p1852_p6), %s2216_s7, 1024, %s337_s24, [#allocation15], %s2221_s13, %s2221_s13, %s1755_s17  }
  0x74   : > { %s1525_s25 = scalar_lea.hbm %s2211_s2, 16 }
  0x75   : > { %p1526_p7 = scmp.ne.s32.totalorder %s2211_s2, %s1525_s25  ;;  %p1532_p1 = scmp.lt.u32.totalorder %s1525_s25, %s2211_s2 }
  0x77   : > { %p1528_p9 = pnand %p1526_p7, %p1866_p8 }
  0x79   : > { %p1529_p4 = pneg %p1528_p9 }
  0x7b   : > { %p1534_p3 = pnand %p1532_p1, %p1529_p4 }
  0x7d   : > { %1537 = shalt.err (!%p1534_p3)
}
  0x7e   : > { %s1538_s20 = scalar_lea.vmem %s279_s26, 16  ;;  %s1545_s24 = scalar_lea.vmem %s279_s26, 32 }
  0x7f   : > { %p1539_p10 = scmp.ne.s32.totalorder %s279_s26, %s1538_s20  ;;  %p1546_p13 = scmp.lt.s32.totalorder %s279_s26, %s279_s26 }
  0x80   : > { %p1547_p0 = scmp.lt.s32.totalorder %s1545_s24, %s1538_s20 }
  0x81   : > { %p1541_p11 = pnand %p1539_p10, %p1866_p8 }
  0x82   : > { %p1548_p2 = por %p1547_p0, %p1546_p13 }
  0x83   : > { %p1542_p12 = pneg %p1541_p11 }
  0x85   : > { %p1549_p5 = pnand %p1548_p2, %p1542_p12 }
  0x87   : > { %1552 = shalt.err (!%p1549_p5)
}
  0x88   : > { %1324 = dma.hbm_to_vmem [thread:$0]  (!%p1852_p6), %s2211_s2, 16, %s279_s26, [#allocation6]  }
  0x89   : > { %s1758_s3 = smov [#allocation10]   ;;  %s1759_s23 = smov [#allocation13]  }
  0x8a   : > { %s302_s22 = sshll.u32 %s1758_s3, 4  ;;  %s326_s25 = sshll.u32 %s1759_s23, 4  ;;  %s303_s22 = int_to_ptr.vmem [resolvable:$true] %s302_s22  ;;  %s327_s25 = int_to_ptr.vmem [resolvable:$true] %s326_s25 }
  0x8b   : > { %s1553_s14 = scalar_lea.hbm %s2213_s4, 16 }
  0x8c   : > { %p1554_p7 = scmp.ne.s32.totalorder %s2213_s4, %s1553_s14  ;;  %p1560_p1 = scmp.lt.u32.totalorder %s1553_s14, %s2213_s4 }
  0x8e   : > { %p1556_p9 = pnand %p1554_p7, %p1866_p8 }
  0x90   : > { %p1557_p4 = pneg %p1556_p9 }
  0x92   : > { %p1562_p3 = pnand %p1560_p1, %p1557_p4 }
  0x94   : > { %1565 = shalt.err (!%p1562_p3)
}
  0x95   : > { %s1566_s26 = scalar_lea.vmem %s303_s22, 16  ;;  %s1573_s1 = scalar_lea.vmem %s303_s22, 32 }
  0x96   : > { %p1567_p10 = scmp.ne.s32.totalorder %s303_s22, %s1566_s26  ;;  %p1574_p13 = scmp.lt.s32.totalorder %s303_s22, %s303_s22 }
  0x97   : > { %p1575_p0 = scmp.lt.s32.totalorder %s1573_s1, %s1566_s26 }
  0x98   : > { %p1569_p11 = pnand %p1567_p10, %p1866_p8 }
  0x99   : > { %p1576_p2 = por %p1575_p0, %p1574_p13 }
  0x9a   : > { %p1570_p12 = pneg %p1569_p11 }
  0x9c   : > { %p1577_p5 = pnand %p1576_p2, %p1570_p12 }
  0x9e   : > { %1580 = shalt.err (!%p1577_p5)
}
  0x9f   : > { %1330 = dma.hbm_to_vmem [thread:$0]  (!%p1852_p6), %s2213_s4, 16, %s303_s22, [#allocation9]  }
  0xa0   : > { %s1581_s14 = scalar_lea.hbm %s2215_s6, 16 }
  0xa1   : > { %p1582_p7 = scmp.ne.s32.totalorder %s2215_s6, %s1581_s14  ;;  %p1588_p1 = scmp.lt.u32.totalorder %s1581_s14, %s2215_s6 }
  0xa3   : > { %p1584_p9 = pnand %p1582_p7, %p1866_p8 }
  0xa5   : > { %p1585_p4 = pneg %p1584_p9 }
  0xa7   : > { %p1590_p3 = pnand %p1588_p1, %p1585_p4 }
  0xa9   : > { %1593 = shalt.err (!%p1590_p3)
}
  0xaa   : > { %s1594_s26 = scalar_lea.vmem %s327_s25, 16  ;;  %s1601_s22 = scalar_lea.vmem %s327_s25, 32 }
  0xab   : > { %p1595_p10 = scmp.ne.s32.totalorder %s327_s25, %s1594_s26  ;;  %p1602_p13 = scmp.lt.s32.totalorder %s327_s25, %s327_s25 }
  0xac   : > { %p1603_p0 = scmp.lt.s32.totalorder %s1601_s22, %s1594_s26 }
  0xad   : > { %p1597_p11 = pnand %p1595_p10, %p1866_p8 }
  0xae   : > { %p1604_p2 = por %p1603_p0, %p1602_p13 }
  0xaf   : > { %p1598_p12 = pneg %p1597_p11 }
  0xb1   : > { %p1605_p5 = pnand %p1604_p2, %p1598_p12 }
  0xb3   : > { %1608 = shalt.err (!%p1605_p5)
}
  0xb4   : > { %1336 = dma.hbm_to_vmem [thread:$0]  (!%p1852_p6), %s2215_s6, 16, %s327_s25, [#allocation12]  }
  0xb5   : > { %s1760_s23 = smov [#allocation16]   ;;  %s1609_s18 = scalar_lea.hbm %s2217_s8, 16 }
  0xb6   : > { %s350_s28 = sshll.u32 %s1760_s23, 4  ;;  %p1610_p7 = scmp.ne.s32.totalorder %s2217_s8, %s1609_s18  ;;  %s351_s28 = int_to_ptr.vmem [resolvable:$true] %s350_s28 }
  0xb7   : > { %p1616_p1 = scmp.lt.u32.totalorder %s1609_s18, %s2217_s8 }
  0xb8   : > { %p1612_p9 = pnand %p1610_p7, %p1866_p8 }
  0xba   : > { %p1613_p4 = pneg %p1612_p9 }
  0xbc   : > { %p1618_p3 = pnand %p1616_p1, %p1613_p4 }
  0xbe   : > { %1621 = shalt.err (!%p1618_p3)
}
  0xbf   : > { %s1622_s25 = scalar_lea.vmem %s351_s28, 16  ;;  %s1629_s22 = scalar_lea.vmem %s351_s28, 32 }
  0xc0   : > { %p1623_p10 = scmp.ne.s32.totalorder %s351_s28, %s1622_s25  ;;  %p1630_p13 = scmp.lt.s32.totalorder %s351_s28, %s351_s28 }
  0xc1   : > { %p1631_p0 = scmp.lt.s32.totalorder %s1629_s22, %s1622_s25 }
  0xc2   : > { %p1625_p11 = pnand %p1623_p10, %p1866_p8 }
  0xc3   : > { %p1632_p2 = por %p1631_p0, %p1630_p13 }
  0xc4   : > { %p1626_p12 = pneg %p1625_p11 }
  0xc6   : > { %p1633_p5 = pnand %p1632_p2, %p1626_p12 }
  0xc8   : > { %1636 = shalt.err (!%p1633_p5)
}
  0xc9   : > { %1342 = dma.hbm_to_vmem [thread:$0]  (!%p1852_p6), %s2217_s8, 16, %s351_s28, [#allocation15]  }
  0xca   : > { %s1086_s27 = sadd.s32 4294967294, %s1749_s12   ;;  %s2029_s19 = sadd.s32 1, %s1749_s12  }
  0xcb   : > { %s33_s23 = ssub.s32 %s1749_s12, %s2029_s19  ;;  %s36_s29 = sadd.s32 1, %s1745_s11 }
  0xcc   : > { %p34_p8 = scmp.eq.s32.totalorder %s33_s23, 0  ;;  %p43_p7 = scmp.ne.s32.totalorder %s1745_s11, %s1741_s10 }
  0xcd   : > { %p44_p9 = scmp.eq.s32.totalorder %s1749_s12, 0  ;;  %p49_p4 = scmp.ne.s32.totalorder %s1741_s10, %s1737_s30 }
  0xce   : > { %s2040_s14 = scalar_select %p34_p8, %s1745_s11, %s36_s29  }
  0xcf   : > { %p2042_p1 = por %p44_p9, %p43_p7  ;;  %p2231_p3 = scmp.eq.s32.totalorder %s1836_s15, 0 }
  0xd0   : > { %p241_p10 = scmp.eq.s32.totalorder %s1836_s15, 1  ;;  %p247_p11 = scmp.eq.s32.totalorder %s1086_s27, 1 }
  0xd1   : > { %p2048_p6 = por %p2231_p3, %p49_p4  ;;  %p1359_p12 = scmp.lt.s32.totalorder %s1749_s12, 2 }
  0xd2   : > { %s361_s20 = sand.u32 1, %s1745_s11   ;;  %p2055_p13 = por %p241_p10, %p43_p7 }
  0xd3   : > { %p2059_p0 = por %p247_p11, %p49_p4  ;;  %s1097_s26 = sshll.u32 %s361_s20, 5 }
  0xd4   : > { %s2233_s24 = scalar_select %p2055_p13, 1, 0 }
  0xd5   : > { %s2234_s21 = scalar_select %p2059_p0, 1, 0 }
  0xd6   : > { %s1137_s25 = sshll.u32 %s1749_s12, 9  ;;  %s365_s27 = scalar_lea.vmem [#allocation2], %s1097_s26 }
  0xd7   : > { %s2067_s3 = scalar_lea.hbm %s2209_s0, %s1137_s25  ;;  %s372_s23 = sshll.u32 %s365_s27, 4  ;;  %s2069_s23 = int_to_ptr.vmem [resolvable:$true] %s372_s23 }
  0xd8   : > { %p2073_p2 = pnand %p1359_p12, %p2042_p1  ;;  %s2077_s13 = scalar_lea.sflag [#allocation3], %s361_s20 }
  0xd9   : > { %s1637_s22 = scalar_lea.hbm %s2067_s3, 512  ;;  %s1642_s18 = scalar_lea.hbm %s2209_s0, 1024 }
  0xda   : > { %p1638_p5 = scmp.ne.s32.totalorder %s2067_s3, %s1637_s22  ;;  %p1639_p8 = pneg %p2073_p2 }
  0xdb   : > { %p1643_p4 = scmp.lt.u32.totalorder %s2067_s3, %s2209_s0  ;;  %p1644_p1 = scmp.lt.u32.totalorder %s1642_s18, %s1637_s22 }
  0xdc   : > { %p1640_p7 = pnand %p1639_p8, %p1638_p5  ;;  %p1646_p10 = scmp.lt.u32.totalorder %s1637_s22, %s2067_s3 }
  0xdd   : > { %p1645_p3 = por %p1644_p1, %p1643_p4 }
  0xde   : > { %p1641_p9 = pneg %p1640_p7 }
  0xdf   : > { %p1647_p11 = por %p1646_p10, %p1645_p3 }
  0xe1   : > { %p1648_p12 = pnand %p1647_p11, %p1641_p9 }
  0xe3   : > { %1651 = shalt.err (!%p1648_p12)
}
  0xe4   : > { %s1652_s20 = scalar_lea.vmem %s2069_s23, 512  ;;  %s1761_s26 = smov [#allocation2]  }
  0xe5   : > { %p1653_p5 = scmp.ne.s32.totalorder %s2069_s23, %s1652_s20  ;;  %s1657_s25 = sshll.u32 %s1761_s26, 4  ;;  %s1658_s25 = int_to_ptr.vmem [resolvable:$false] %s1657_s25 }
  0xe6   : > { %s1659_s1 = scalar_lea.vmem %s1658_s25, 1024  ;;  %p1660_p13 = scmp.lt.s32.totalorder %s2069_s23, %s1658_s25 }
  0xe7   : > { %p1655_p7 = pnand %p1653_p5, %p1639_p8  ;;  %p1661_p4 = scmp.lt.s32.totalorder %s1659_s1, %s1652_s20 }
  0xe9   : > { %p1656_p0 = pneg %p1655_p7  ;;  %p1662_p1 = por %p1661_p4, %p1660_p13 }
  0xeb   : > { %p1663_p3 = pnand %p1662_p1, %p1656_p0 }
  0xed   : > { %1666 = shalt.err (!%p1663_p3)
}
  0xee   : > { %s2236_s22 = smov 128   ;;  %p2237_p8 = scmp.ne.s32.totalorder %s2225_s16, 0 }
  0xef   : > { %1346 = dma.hbm_to_vmem [thread:$0]  (!%p2073_p2), %s2067_s3, 512, %s2069_s23, %s2077_s13, %s2236_s22, %s2236_s22, %s1755_s17  }
  0xf0   : > { %384 = sbr.rel (%p2237_p8) target bundleno = 1152 (0x480), region = 56  ;;  %s2111_s18 = sand.u32 (!%p2237_p8), 1, %s1741_s10  }
  0xf1   : > { %s1101_s27 = sshll.u32 (!%p2237_p8), %s2111_s18, 5  ;;  %s387_s20 = scalar_lea.sflag (!%p2237_p8), [#allocation3], %s2111_s18 }
  0xf2   : > { %s390_s29 = scalar_lea.vmem (!%p2237_p8), [#allocation2], %s1101_s27 }
  0xf7   : > { %1712 = dma.done.wait (%p2048_p6), %s387_s20, 512  }
  0xf8   : > { %1714 = vsyncadd (%p2048_p6), %s387_s20, 4294966784  ;;  %p2238_p13 = scmp.eq.s32.totalorder %s1836_s15, 0 }
  0xfa   : > { %1716 = dma.done.wait (%p2238_p13), [#allocation6], 80   ;;  %p2239_p0 = pmov %p2238_p13 }
  0xfc   : > { %1718 = vsyncadd (%p2239_p0), [#allocation6], 4294967216  ;;  %p2240_p2 = pmov %p2239_p0 }
  0xfd   : > { %p2241_p9 = pmov %p2239_p0 }
  0xfe   : > { %1720 = dma.done.wait (%p2240_p2), [#allocation9], 528  }
  0xff   : > { %1722 = vsyncadd (%p2241_p9), [#allocation9], 4294966768  ;;  %p2242_p10 = pmov %p2239_p0 }
 0x100   : > { %p2243_p11 = pmov %p2239_p0 }
 0x101   : > { %1724 = dma.done.wait (%p2242_p10), [#allocation12], 1040  }
 0x102   : > { %1726 = vsyncadd (%p2243_p11), [#allocation12], 4294966256  ;;  %p2244_p6 = pmov %p2239_p0 }
 0x103   : > { %p2245_p12 = pmov %p2239_p0 }
 0x104   : > { %1728 = dma.done.wait (%p2244_p6), [#allocation15], 1040  }
 0x105   : > { %1730 = vsyncadd (%p2245_p12), [#allocation15], 4294966256  ;;  %vm484_vm0 = vcmask 1043456   ;;  %vm471_vm1 = vcmask 31744   ;;  %v463_v0 = vld [vmem:[#allocation5] sm:$0xf] }
 0x106   : > { %v459_v1 = vld [vmem:[%s390_s29] sm:$0xff]  ;;  %v460_v2 = vld [vmem:[%s390_s29 + $0x8] sm:$0xff]  ;;  %1176 = vmatprep.subr.msk.mxu0 %vm484_vm0, %v463_v0  ;;  %v461_v3 = vld [vmem:[%s390_s29 + $0x10] sm:$0xff]  ;;  %vm588_vm2 = vcmask 261120   ;;  %vm705_vm3 = vcmask 523264   ;;  %s456_s16 = scalar_lea.vmem [#allocation17], %s1101_s27 }
 0x107   : > { %1178 = vmatprep.mubr.msk.f32.mxu0 %vm471_vm1, %v459_v1  ;;  %v577_v4 = vld [vmem:[#allocation8] sm:$0xff]  ;;  %1177 = vmatpush3.msk.msra.mxu0 %vm484_vm0, %v463_v0  ;;  %v578_v5 = vld [vmem:[#allocation8 + $0x8] sm:$0xff]  ;;  %v462_v7 = vld [vmem:[%s390_s29 + $0x18] sm:$0xff]  ;;  %s937_s13 = sshll.u32 %s456_s16, 4  ;;  %s1138_s17 = sshll.u32 %s1836_s15, 9  ;;  %s2157_s13 = int_to_ptr.vmem [resolvable:$true] %s937_s13 }
 0x108   : > { %1179 = vmatmul.mubr.msk.f32.vlgmr.msra.gmra.mrb[0].mxu0 %vm471_vm1, %v460_v2  ;;  %v1242_v6 = vpack.c.bf16 %v578_v5, %v577_v4  ;;  %v579_v8 = vld [vmem:[#allocation8 + $0x10] sm:$0xff]  ;;  %v580_v9 = vld [vmem:[#allocation8 + $0x18] sm:$0xff]  ;;  %v690_v11 = vld [vmem:[#allocation11] sm:$0xff]  ;;  %s2163_s23 = scalar_lea.hbm %s2218_s9, %s1138_s17  ;;  %s924_s15 = scalar_lea.sflag [#allocation4], %s2111_s18 }
 0x109   : > { %1181 = vmatprep.mubr.msk.f32.mxu0 %vm471_vm1, %v461_v3  ;;  %v1246_v10 = vpack.c.bf16 %v580_v9, %v579_v8  ;;  %v691_v12 = vld [vmem:[#allocation11 + $0x8] sm:$0xff]  ;;  %v692_v13 = vld [vmem:[#allocation11 + $0x10] sm:$0xff]  ;;  %v693_v15 = vld [vmem:[#allocation11 + $0x18] sm:$0xff]  ;;  %s1667_s26 = scalar_lea.vmem %s2157_s13, 512  ;;  %p2246_p7 = scmp.ne.s32.totalorder %s2233_s24, 0 }
 0x10a   : > { %1243 = vmatprep.subr.bf16.mxu1 %v1242_v6  ;;  %v1250_v14 = vpack.c.bf16 %v691_v12, %v690_v11  ;;  %v1254_v16 = vpack.c.bf16 %v693_v15, %v692_v13  ;;  %v694_v17 = vld [vmem:[#allocation11 + $0x20] sm:$0xff]  ;;  %v695_v18 = vld [vmem:[#allocation11 + $0x28] sm:$0xff]  ;;  %v1111_v20 = vld [vmem:[#allocation7] ss:$0 sm:$0xff]  ;;  %p1668_p5 = scmp.ne.s32.totalorder %s2157_s13, %s1667_s26  ;;  %s1762_s25 = smov [#allocation17]  }
 0x10b   : > { %1245 = vmatpush3.bf16.msra.mxu1 %v1242_v6  ;;  %v1258_v19 = vpack.c.bf16 %v695_v18, %v694_v17  ;;  %v696_v33 = vld [vmem:[#allocation11 + $0x30] sm:$0xff]  ;;  %v697_v34 = vld [vmem:[#allocation11 + $0x38] sm:$0xff]  ;;  %v807_v36 = vld [vmem:[#allocation14] sm:$0xff]  ;;  %s1671_s1 = sshll.u32 %s1762_s25, 4  ;;  %s1672_s1 = int_to_ptr.vmem [resolvable:$false] %s1671_s1 }
 0x10c   : > { %1182 = vmatmul.mubr.msk.f32.gmra.mrb[2].mxu0 %vm471_vm1, %v462_v7  ;;  %1247 = vmatprep.subr.bf16.mxu1 %v1246_v10  ;;  %v1262_v35 = vpack.c.bf16 %v697_v34, %v696_v33  ;;  %v808_v37 = vld [vmem:[#allocation14 + $0x8] sm:$0xff]  ;;  %v809_v38 = vld [vmem:[#allocation14 + $0x10] sm:$0xff]  ;;  %v810_v40 = vld [vmem:[#allocation14 + $0x18] sm:$0xff]  ;;  %p1669_p4 = pnand %p1668_p5, %p2246_p7  ;;  %s1673_s22 = scalar_lea.vmem %s1672_s1, 1024 }
 0x10d   : > { %1251 = vmatprep.subr.bf16.mxu0 %v1250_v14  ;;  %v1266_v39 = vpack.c.bf16 %v808_v37, %v807_v36  ;;  %v1270_v41 = vpack.c.bf16 %v810_v40, %v809_v38  ;;  %v811_v42 = vld [vmem:[#allocation14 + $0x20] sm:$0xff]  ;;  %v812_v43 = vld [vmem:[#allocation14 + $0x28] sm:$0xff]  ;;  %v1117_v45 = vld [vmem:[#allocation10] ss:$0 sm:$0xff]  ;;  %p1674_p3 = scmp.lt.s32.totalorder %s2157_s13, %s1672_s1  ;;  %p1675_p8 = scmp.lt.s32.totalorder %s1673_s22, %s1667_s26 }
 0x10e   : > { %1253 = vmatpush3.bf16.msra.mxu0 %v1250_v14  ;;  %v1274_v44 = vpack.c.bf16 %v812_v43, %v811_v42  ;;  %v813_v58 = vld [vmem:[#allocation14 + $0x30] sm:$0xff]  ;;  %v814_v59 = vld [vmem:[#allocation14 + $0x38] sm:$0xff]  ;;  %p1670_p1 = pneg %p1669_p4 }
 0x10f   : > { %1249 = vmatpush3.bf16.msra.mxu1 %v1246_v10  ;;  %1255 = vmatprep.subr.bf16.mxu0 %v1254_v16  ;;  %v1278_v60 = vpack.c.bf16 %v814_v59, %v813_v58  ;;  %v1122_v61 = vld [vmem:[#allocation13] ss:$0 sm:$0xff]  ;;  %v1127_v10 = vld [vmem:[#allocation16] ss:$0 sm:$0xff]  ;;  %p1676_p13 = por %p1675_p8, %p1674_p3 }
 0x110   : > { %1267 = vmatprep.subr.bf16.mxu1 %v1266_v39 }
 0x111   : > { %p1677_p0 = pnand %p1676_p13, %p1670_p1 }
 0x112   : > { %1257 = vmatpush3.bf16.msra.mxu0 %v1254_v16 }
 0x113   : > { %1259 = vmatprep.subr.bf16.mxu0 %v1258_v19 }
 0x116   : > { %1261 = vmatpush3.bf16.msra.mxu0 %v1258_v19 }
 0x117   : > { %1263 = vmatprep.subr.bf16.mxu0 %v1262_v35 }
 0x11a   : > { %1265 = vmatpush3.bf16.msra.mxu0 %v1262_v35 }
 0x1db   : > { %v1180_v21 = vpop.f32.mrb[0].mxu0 }
 0x1dc   : > { %v560_v22 = vadd.f32 %v1180_v21, %v1111_v20  ;;  %v554_v23 = vpop.f32.mrb[1].mxu0 }
 0x1dd   : > { %v555_v24 = vadd.f32 %v1111_v20, %v554_v23 }
 0x1de   : > { %v574_v27 = vmax.f32 %v560_v22, 0.0 }
 0x1df   : > { %v573_v25 = vmax.f32 %v555_v24, 0.0  ;;  %v1183_v26 = vpop.f32.mrb[2].mxu0 }
 0x1e0   : > { %v570_v28 = vadd.f32 %v1183_v26, %v1111_v20  ;;  %v564_v29 = vpop.f32.mrb[3].mxu0 }
 0x1e1   : > { %v565_v30 = vadd.f32 %v1111_v20, %v564_v29  ;;  %1192 = vmatprep.mubr.msk.f32.mxu1 %vm588_vm2, %v573_v25 }
 0x1e2   : > { %1193 = vmatmul.mubr.msk.f32.vlgmr.msra.gmra.mrb[0].mxu1 %vm588_vm2, %v574_v27  ;;  %v576_v32 = vmax.f32 %v570_v28, 0.0 }
 0x1e3   : > { %v575_v31 = vmax.f32 %v565_v30, 0.0  ;;  %1269 = vmatpush3.bf16.msra.mxu1 %v1266_v39 }
 0x1e4   : > { %1271 = vmatprep.subr.bf16.mxu1 %v1270_v41 }
 0x1e5   : > { %1195 = vmatprep.mubr.msk.f32.mxu1 %vm588_vm2, %v575_v31 }
 0x1e6   : > { %1196 = vmatmul.mubr.msk.f32.gmra.mrb[2].mxu1 %vm588_vm2, %v576_v32 }
 0x1e7   : > { %1273 = vmatpush3.bf16.msra.mxu1 %v1270_v41 }
 0x1e8   : > { %1275 = vmatprep.subr.bf16.mxu1 %v1274_v44 }
 0x1eb   : > { %1277 = vmatpush3.bf16.msra.mxu1 %v1274_v44 }
 0x1ec   : > { %1279 = vmatprep.subr.bf16.mxu1 %v1278_v60 }
 0x1ef   : > { %1281 = vmatpush3.bf16.msra.mxu1 %v1278_v60 }
 0x2b5   : > { %v1194_v46 = vpop.f32.mrb[0].mxu1 }
 0x2b6   : > { %v673_v47 = vadd.f32 %v1194_v46, %v1117_v45  ;;  %v667_v48 = vpop.f32.mrb[1].mxu1 }
 0x2b7   : > { %v668_v49 = vadd.f32 %v1117_v45, %v667_v48 }
 0x2b8   : > { %v687_v52 = vmax.f32 %v673_v47, 0.0 }
 0x2b9   : > { %v686_v50 = vmax.f32 %v668_v49, 0.0  ;;  %v1197_v51 = vpop.f32.mrb[2].mxu1 }
 0x2ba   : > { %v683_v53 = vadd.f32 %v1197_v51, %v1117_v45  ;;  %v677_v54 = vpop.f32.mrb[3].mxu1 }
 0x2bb   : > { %v678_v55 = vadd.f32 %v1117_v45, %v677_v54  ;;  %1214 = vmatprep.mubr.msk.f32.mxu0 %vm705_vm3, %v686_v50 }
 0x2bc   : > { %1215 = vmatmul.mubr.msk.f32.vlgmr.msra.gmra.mrb[4].mxu0 %vm705_vm3, %v687_v52  ;;  %v689_v57 = vmax.f32 %v683_v53, 0.0 }
 0x2bd   : > { %v688_v56 = vmax.f32 %v678_v55, 0.0 }
 0x2bf   : > { %1217 = vmatprep.mubr.msk.f32.mxu0 %vm705_vm3, %v688_v56 }
 0x2c0   : > { %1218 = vmatmul.mubr.msk.f32.gmra.mrb[6].mxu0 %vm705_vm3, %v689_v57 }
 0x38f   : > { %v1216_v62 = vpop.f32.mrb[4].mxu0 }
 0x390   : > { %v790_v63 = vadd.f32 %v1216_v62, %v1122_v61  ;;  %v784_v0 = vpop.f32.mrb[5].mxu0 }
 0x391   : > { %v785_v1 = vadd.f32 %v1122_v61, %v784_v0 }
 0x392   : > { %v804_v4 = vmax.f32 %v790_v63, 0.0 }
 0x393   : > { %v803_v2 = vmax.f32 %v785_v1, 0.0  ;;  %v1219_v3 = vpop.f32.mrb[6].mxu0 }
 0x394   : > { %v800_v5 = vadd.f32 %v1219_v3, %v1122_v61  ;;  %v794_v6 = vpop.f32.mrb[7].mxu0 }
 0x395   : > { %v795_v7 = vadd.f32 %v1122_v61, %v794_v6  ;;  %1236 = vmatprep.mubr.msk.f32.mxu1 %vm705_vm3, %v803_v2 }
 0x396   : > { %1237 = vmatmul.mubr.msk.f32.vlgmr.msra.gmra.mrb[4].mxu1 %vm705_vm3, %v804_v4  ;;  %v806_v9 = vmax.f32 %v800_v5, 0.0 }
 0x397   : > { %v805_v8 = vmax.f32 %v795_v7, 0.0 }
 0x399   : > { %1239 = vmatprep.mubr.msk.f32.mxu1 %vm705_vm3, %v805_v8 }
 0x39a   : > { %1240 = vmatmul.mubr.msk.f32.gmra.mrb[6].mxu1 %vm705_vm3, %v806_v9 }
 0x469   : > { %v1238_v11 = vpop.f32.mrb[4].mxu1 }
 0x46a   : > { %v906_v12 = vadd.f32 %v1238_v11, %v1127_v10  ;;  %v900_v13 = vpop.f32.mrb[5].mxu1 }
 0x46b   : > { %v901_v14 = vadd.f32 %v1127_v10, %v900_v13 }
 0x46c   : > { %920 = vst.msk [vmem:[%s456_s16 + $0x8] sm:$0xff] %vm588_vm2, %v906_v12 }
 0x46d   : > { %919 = vst.msk [vmem:[%s456_s16] sm:$0xff] %vm588_vm2, %v901_v14  ;;  %v1241_v15 = vpop.f32.mrb[6].mxu1 }
 0x46e   : > { %v916_v16 = vadd.f32 %v1241_v15, %v1127_v10  ;;  %v910_v17 = vpop.f32.mrb[7].mxu1 }
 0x46f   : > { %v911_v18 = vadd.f32 %v1127_v10, %v910_v17 }
 0x470   : > { %922 = vst.msk [vmem:[%s456_s16 + $0x18] sm:$0xff] %vm588_vm2, %v916_v16 }
 0x471   : > { %921 = vst.msk [vmem:[%s456_s16 + $0x10] sm:$0xff] %vm588_vm2, %v911_v18 }
 0x472   : > { %1680 = shalt.err (!%p1677_p0)
}
 0x473   : > { %s1681_s27 = scalar_lea.hbm %s2163_s23, 512  ;;  %s1685_s16 = scalar_lea.hbm %s2218_s9, 1024 }
 0x474   : > { %p1682_p2 = scmp.ne.s32.totalorder %s2163_s23, %s1681_s27  ;;  %p1686_p11 = scmp.lt.u32.totalorder %s2163_s23, %s2218_s9 }
 0x475   : > { %p1687_p6 = scmp.lt.u32.totalorder %s1685_s16, %s1681_s27  ;;  %p1689_p5 = scmp.lt.u32.totalorder %s1681_s27, %s2163_s23 }
 0x476   : > { %p1683_p9 = pnand %p1682_p2, %p2246_p7 }
 0x477   : > { %p1688_p12 = por %p1687_p6, %p1686_p11 }
 0x478   : > { %p1684_p10 = pneg %p1683_p9 }
 0x479   : > { %p1690_p4 = por %p1689_p5, %p1688_p12 }
 0x47b   : > { %p1691_p1 = pnand %p1690_p4, %p1684_p10 }
 0x47d   : > { %1694 = shalt.err (!%p1691_p1)
}
 0x47e   : > { %s1763_s3 = smov 128   ;;  %s1764_s26 = smov 8  }
 0x47f   : > { %1316 = dma.vmem_to_hbm [thread:$0]  (%p2246_p7), %s2157_s13, 512, %s2163_s23, %s924_s15, %s1763_s3, %s1763_s3, %s1764_s26  }
 0x480 PF: > { %s952_s25 = sand.u32 1, %s1737_s30   ;;  %p2247_p3 = scmp.ne.s32.totalorder %s2234_s21, 0 }
 0x481   : > { %p2248_p8 = scmp.ge.s32.totalorder %s1749_s12, 2  ;;  %s953_s1 = scalar_lea.sflag [#allocation4], %s952_s25 }
 0x483   : > { %p1348_p13 = pnand %p2248_p8, %p2247_p3 }
 0x485   : > { %1732 = dma.done.wait (!%p1348_p13), %s953_s1, 512  }
 0x486   : > { %1734 = vsyncadd (!%p1348_p13), %s953_s1, 4294966784  ;;  %p26_p0 = scmp.ge.s32.totalorder %s2029_s19, 4   ;;  %s2249_s30 = smov %s1741_s10 }
 0x487   : > { %s2250_s10 = smov %s1745_s11  ;;  %s2251_s11 = smov %s2040_s14 }
 0x488   : > { %s2252_s12 = smov %s2029_s19  ;;  %28 = sbr.rel (!%p26_p0) target bundleno = 12 (0xc), region = 133 }
 0x48f   :  { %958 = vsyncpa [#allocation3], 1 }
 0x490   :  { %960 = vsyncpa [#allocation3 + $0x1], 1 }
 0x491   :  { %961 = vsyncpa [#allocation6], 1 }
 0x492   :  { %962 = vsyncpa [#allocation9], 1 }
 0x493   :  { %963 = vsyncpa [#allocation12], 1 }
 0x494   :  { %964 = vsyncpa [#allocation15], 1 }
 0x495   :  { %965 = vsyncpa [#allocation4], 1 }
 0x496   :  { %967 = vsyncpa [#allocation4 + $0x1], 1 }

</bundles_post_ra>
